<compile_context>
chip_gen: v7x
topology: tpu7x:2x2x1
jax: 0.10.0
libtpu: 0.0.40
codegen_flags: <defaults>
</compile_context>

<pallas_src>
import jax
import jax.numpy as jnp
from jax import lax
from jax.experimental import pallas as pl
from jax.experimental.pallas import tpu as pltpu


# ----------------------------------------------------------------------------
# Single fused kernel per layer: input projection + full time recurrence.
#   x_ref    : (S*B, I)   layer input, flattened over time*batch (compute_dtype)
#   w_ih_ref : (I, 4H)    input weights (compute_dtype)
#   w_hh_ref : (4H, 4H)   recurrent weights, rows [H, 4H) zero-padded (compute_dtype)
#   b_ref    : (1, 4H)    combined bias b_ih + b_hh (f32)
#   h0_ref   : (B, 4H)    initial hidden state, lanes [0, H) valid, rest zero (f32)
#   c0_ref   : (B, 4H)    initial cell state,   lanes [0, H) valid, rest zero (f32)
#   out_ref  : (S*B, H)   h_t for every step (f32)
#   cn_ref   : (B, H)     final cell state (f32)
#   xp_ref   : VMEM (S*B, 4H) scratch -- fused input projection
#   hist_ref : VMEM (S*B, 4H) scratch -- per-step lane-padded h, bulk-stored at end
# ----------------------------------------------------------------------------
def _lstm_layer_kernel(x_ref, w_ih_ref, w_hh_ref, b_ref, h0_ref, c0_ref,
                       out_ref, cn_ref, xp_ref, hist_ref):
    B, G = h0_ref.shape
    H = G // 4
    S = xp_ref.shape[0] // B

    # 1) Fused, lane-dense input projection for the whole sequence (4H = 128
    #    maps exactly onto the 128-lane vreg axis).  Stays in VMEM scratch.
    xp_ref[...] = (
        jnp.dot(x_ref[...], w_ih_ref[...], preferred_element_type=jnp.float32)
        + b_ref[...]
    )

    w_hh = w_hh_ref[...]                       # (4H, 4H); rows >= H are zero
    mm_dtype = w_hh.dtype

    # Lane mask selecting the g-gate block (lanes [2H, 3H)).
    lane = lax.broadcasted_iota(jnp.int32, (B, G), 1)
    is_g = jnp.logical_and(lane >= 2 * H, lane < 3 * H)
    pre_scale = jnp.where(is_g, 1.0, 0.5)      # x/2 on i,f,o lanes for sigmoid

    # 2) Time recurrence with h/c carried as values (vregs).  State is kept
    #    lane-padded to 4H so no lane sub-slicing is needed inside the loop:
    #    the zero rows of w_hh make h4 @ w_hh == h[:, :H] @ W_hh exactly
    #    (the padding lanes stay bounded, so no NaN/Inf can leak in).
    h4 = h0_ref[...]                           # (B, 4H), valid in lanes [0, H)
    c4 = c0_ref[...]
    for t in range(S):                         # static unroll; all slices static
        xp_t = xp_ref[t * B:(t + 1) * B, :]    # (B, 4H)
        gates = xp_t + jnp.dot(h4.astype(mm_dtype), w_hh,
                               preferred_element_type=jnp.float32)
        # One EUP tanh for all four gate blocks: sigmoid(x) = 0.5*tanh(x/2)+0.5
        th = jnp.tanh(gates * pre_scale)
        act = jnp.where(is_g, th, 0.5 * th + 0.5)   # [sig(i)|sig(f)|tanh(g)|sig(o)]
        # Align f/g/o with the i block using XLU lane rotations (jnp.roll
        # semantics: positive shift moves lanes to higher indices).
        act_f = pltpu.roll(act, 3 * H, 1)      # f -> lanes [0, H)
        act_g = pltpu.roll(act, 2 * H, 1)      # g -> lanes [0, H)
        act_o = pltpu.roll(act, 1 * H, 1)      # o -> lanes [0, H)
        c4 = act_f * c4 + act * act_g          # valid in lanes [0, H)
        h4 = act_o * jnp.tanh(c4)
        hist_ref[t * B:(t + 1) * B, :] = h4    # VMEM scratch, static slice

    # 3) Bulk writeback: one store for the whole h-sequence, one for cn.
    hist = hist_ref[...]
    out_ref[...] = hist[:, :H]
    cn_ref[...] = c4[:, :H]


def _lstm_single_layer(x, h0, c0, w_ih, w_hh, b, *, compute_dtype=jnp.float32):
    """One LSTM layer.

    x: (S,B,I); h0/c0: (B,H); w_ih: (I,4H); w_hh: (H,4H); b: (4H,) (= b_ih+b_hh).
    Returns (out (S,B,H), hn (B,H), cn (B,H)).
    """
    S, B, I = x.shape
    H = w_hh.shape[0]
    G = 4 * H

    x2d = x.reshape(S * B, I).astype(compute_dtype)
    w_ih_c = w_ih.astype(compute_dtype)
    # Zero-pad W_hh rows to (4H, 4H) so the recurrent matmul can consume the
    # lane-padded (B, 4H) hidden state without any in-loop lane slicing.
    w_hh_pad = jnp.zeros((G, G), compute_dtype).at[:H, :].set(
        w_hh.astype(compute_dtype))
    b2d = b.reshape(1, G).astype(jnp.float32)
    pad = ((0, 0), (0, G - H))
    h0_pad = jnp.pad(h0.astype(jnp.float32), pad)
    c0_pad = jnp.pad(c0.astype(jnp.float32), pad)

    out2d, cn = pl.pallas_call(
        _lstm_layer_kernel,
        out_shape=(
            jax.ShapeDtypeStruct((S * B, H), jnp.float32),
            jax.ShapeDtypeStruct((B, H), jnp.float32),
        ),
        in_specs=[
            pl.BlockSpec((S * B, I), lambda: (0, 0)),
            pl.BlockSpec((I, G), lambda: (0, 0)),
            pl.BlockSpec((G, G), lambda: (0, 0)),
            pl.BlockSpec((1, G), lambda: (0, 0)),
            pl.BlockSpec((B, G), lambda: (0, 0)),
            pl.BlockSpec((B, G), lambda: (0, 0)),
        ],
        out_specs=(
            pl.BlockSpec((S * B, H), lambda: (0, 0)),
            pl.BlockSpec((B, H), lambda: (0, 0)),
        ),
        scratch_shapes=[
            pltpu.VMEM((S * B, G), jnp.float32),   # xp: fused input projection
            pltpu.VMEM((S * B, G), jnp.float32),   # per-step h history
        ],
        compiler_params=pltpu.CompilerParams(
            # Explicit VMEM budget; raise / chunk the time axis when S, H are
            # scaled up (v7x has only 64 MiB physical VMEM per TensorCore).
            vmem_limit_bytes=32 * 1024 * 1024,
        ),
    )(x2d, w_ih_c, w_hh_pad, b2d, h0_pad, c0_pad)

    out = out2d.reshape(S, B, H).astype(x.dtype)
    hn = out[-1]                   # hn is exactly the last output step
    return out, hn, cn.astype(x.dtype)


def lstm_forward(state, params, *, compute_dtype=jnp.float32):
    """Pallas equivalent of LSTM.forward.

    state : (x,) or (x, (hx, cx));  x: (S, B, iSize);  hx, cx: (nLayer, B, H)
    params: list of per-layer (w_ih (I_l, 4H), w_hh (H, 4H), b (4H,)) where
            b = b_ih + b_hh (PyTorch's two biases, pre-summed).
    Returns (output (S, B, H), (hn (L, B, H), cn (L, B, H))).
    """
    L = len(params)
    H = params[0][1].shape[0]
    if len(state) == 2:
        x, (hx, cx) = state
    else:
        x = state[0]
        B = x.shape[1]
        hx = jnp.zeros((L, B, H), x.dtype)
        cx = jnp.zeros((L, B, H), x.dtype)

    layer_in = x
    hn_list, cn_list = [], []
    for l, (w_ih, w_hh, b) in enumerate(params):
        layer_in, hn, cn = _lstm_single_layer(
            layer_in, hx[l], cx[l], w_ih, w_hh, b, compute_dtype=compute_dtype)
        hn_list.append(hn)
        cn_list.append(cn)
    return layer_in, (jnp.stack(hn_list), jnp.stack(cn_list))


# ----------------------------------------------------------------------------
# Pure-JAX reference (matches torch.nn.LSTM math with combined bias).  When
# compute_dtype != f32 it applies the same operand casts as the kernel, so the
# comparison isolates the kernel implementation, not the quantization choice.
# ----------------------------------------------------------------------------
def lstm_reference(x, hx, cx, params, compute_dtype=jnp.float32):
    S = x.shape[0]
    layer_in = x.astype(jnp.float32)
    hs, cs = [], []
    for l, (w_ih, w_hh, b) in enumerate(params):
        H = w_hh.shape[0]
        w_ih_c = w_ih.astype(compute_dtype).astype(jnp.float32)
        w_hh_c = w_hh.astype(compute_dtype).astype(jnp.float32)
        h = hx[l].astype(jnp.float32)
        c = cx[l].astype(jnp.float32)
        outs = []
        for t in range(S):
            x_t = layer_in[t].astype(compute_dtype).astype(jnp.float32)
            h_t = h.astype(compute_dtype).astype(jnp.float32)
            gates = x_t @ w_ih_c + h_t @ w_hh_c + b
            i_g = jax.nn.sigmoid(gates[:, 0 * H:1 * H])
            f_g = jax.nn.sigmoid(gates[:, 1 * H:2 * H])
            g_g = jnp.tanh(gates[:, 2 * H:3 * H])
            o_g = jax.nn.sigmoid(gates[:, 3 * H:4 * H])
            c = f_g * c + i_g * g_g
            h = o_g * jnp.tanh(c)
            outs.append(h)
        layer_in = jnp.stack(outs, axis=0)
        hs.append(h)
        cs.append(c)
    return layer_in, (jnp.stack(hs), jnp.stack(cs))


if __name__ == "__main__":
    key = jax.random.PRNGKey(0)
    S, B, I, H, L = 8, 2, 16, 32, 1  # seq, batch, iSize, hiddenSize, nLayer
    keys = jax.random.split(key, 9)

    x = jax.random.normal(keys[0], (S, B, I), dtype=jnp.float32)
    hx = jax.random.normal(keys[1], (L, B, H), dtype=jnp.float32)
    cx = jax.random.normal(keys[2], (L, B, H), dtype=jnp.float32)

    bound = 1.0 / (H ** 0.5)  # PyTorch nn.LSTM init range
    w_ih = jax.random.uniform(keys[3], (I, 4 * H), jnp.float32, -bound, bound)
    w_hh = jax.random.uniform(keys[4], (H, 4 * H), jnp.float32, -bound, bound)
    b = jax.random.uniform(keys[5], (4 * H,), jnp.float32, -bound, bound)
    params = [(w_ih, w_hh, b)]

    # --- Branch 1: explicit initial state, len(state) == 2 (f32 path) -------
    out, (hn, cn) = lstm_forward((x, (hx, cx)), params)
    jax.block_until_ready((out, hn, cn))
    ref_out, (ref_hn, ref_cn) = lstm_reference(x, hx, cx, params)
    assert out.shape == (S, B, H) and hn.shape == (L, B, H) and cn.shape == (L, B, H)
    assert jnp.allclose(out, ref_out, rtol=2e-3, atol=2e-3), "output mismatch"
    assert jnp.allclose(hn, ref_hn, rtol=2e-3, atol=2e-3), "hn mismatch"
    assert jnp.allclose(cn, ref_cn, rtol=2e-3, atol=2e-3), "cn mismatch"

    # --- Branch 2: no initial state (zeros), len(state) == 1 ----------------
    out2, (hn2, cn2) = lstm_forward((x,), params)
    jax.block_until_ready((out2, hn2, cn2))
    z = jnp.zeros((L, B, H), jnp.float32)
    ref_out2, (ref_hn2, ref_cn2) = lstm_reference(x, z, z, params)
    assert jnp.allclose(out2, ref_out2, rtol=2e-3, atol=2e-3), "output mismatch (zero state)"
    assert jnp.allclose(hn2, ref_hn2, rtol=2e-3, atol=2e-3), "hn mismatch (zero state)"
    assert jnp.allclose(cn2, ref_cn2, rtol=2e-3, atol=2e-3), "cn mismatch (zero state)"

    # --- Multi-layer check: nLayer = 2 (f32 path) ----------------------------
    L2 = 2
    w_ih2 = jax.random.uniform(keys[6], (H, 4 * H), jnp.float32, -bound, bound)
    w_hh2 = jax.random.uniform(keys[7], (H, 4 * H), jnp.float32, -bound, bound)
    b2 = jax.random.uniform(keys[8], (4 * H,), jnp.float32, -bound, bound)
    params2 = [(w_ih, w_hh, b), (w_ih2, w_hh2, b2)]
    hx2 = jnp.concatenate([hx, hx], axis=0)
    cx2 = jnp.concatenate([cx, cx], axis=0)
    out3, (hn3, cn3) = lstm_forward((x, (hx2, cx2)), params2)
    jax.block_until_ready((out3, hn3, cn3))
    ref_out3, (ref_hn3, ref_cn3) = lstm_reference(x, hx2, cx2, params2)
    assert out3.shape == (S, B, H) and hn3.shape == (L2, B, H)
    assert jnp.allclose(out3, ref_out3, rtol=2e-3, atol=2e-3), "output mismatch (2 layers)"
    assert jnp.allclose(hn3, ref_hn3, rtol=2e-3, atol=2e-3), "hn mismatch (2 layers)"
    assert jnp.allclose(cn3, ref_cn3, rtol=2e-3, atol=2e-3), "cn mismatch (2 layers)"

    # --- bf16 matmul-operand path (v6e / v7x MXU), f32 accumulate & state ----
    out_bf, (hn_bf, cn_bf) = lstm_forward((x, (hx, cx)), params,
                                          compute_dtype=jnp.bfloat16)
    jax.block_until_ready((out_bf, hn_bf, cn_bf))
    ref_out_bf, (ref_hn_bf, ref_cn_bf) = lstm_reference(
        x, hx, cx, params, compute_dtype=jnp.bfloat16)
    assert jnp.allclose(out_bf, ref_out_bf, rtol=5e-2, atol=5e-2), "output mismatch (bf16)"
    assert jnp.allclose(cn_bf, ref_cn_bf, rtol=5e-2, atol=5e-2), "cn mismatch (bf16)"

    print("KERNEL_OK")
</pallas_src>

<mosaic_0001>
module attributes {stable_mosaic.version = 11 : i64} {
  func.func @_lstm_layer_kernel(%arg0: memref<16x16xf32, #tpu.memory_space<vmem>>, %arg1: memref<16x128xf32, #tpu.memory_space<vmem>>, %arg2: memref<128x128xf32, #tpu.memory_space<vmem>>, %arg3: memref<1x128xf32, #tpu.memory_space<vmem>>, %arg4: memref<2x128xf32, #tpu.memory_space<vmem>>, %arg5: memref<2x128xf32, #tpu.memory_space<vmem>>, %arg6: memref<16x32xf32, #tpu.memory_space<vmem>>, %arg7: memref<2x32xf32, #tpu.memory_space<vmem>>, %arg8: memref<16x128xf32, #tpu.memory_space<vmem>>, %arg9: memref<16x128xf32, #tpu.memory_space<vmem>>) attributes {dimension_semantics = [], scalar_prefetch = 0 : i64, scratch_operands = 2 : i64, tpu.core_type = #tpu.core_type<tc>} {
    %c0 = arith.constant 0 : index
    %c0_0 = arith.constant 0 : index
    %0 = vector.load %arg0[%c0, %c0_0] : memref<16x16xf32, #tpu.memory_space<vmem>>, vector<16x16xf32>
    %c0_1 = arith.constant 0 : index
    %c0_2 = arith.constant 0 : index
    %1 = vector.load %arg1[%c0_1, %c0_2] : memref<16x128xf32, #tpu.memory_space<vmem>>, vector<16x128xf32>
    %cst = arith.constant dense<0.000000e+00> : vector<16x128xf32>
    %2 = tpu.matmul %0, %1, %cst {dimension_numbers = #tpu.dot_dimension_numbers<[1], [0], [0], [1], [0, 0, 1, 1], [], []>} : vector<16x16xf32>, vector<16x128xf32>, vector<16x128xf32> -> vector<16x128xf32>
    %c0_3 = arith.constant 0 : index
    %c0_4 = arith.constant 0 : index
    %3 = vector.load %arg3[%c0_3, %c0_4] : memref<1x128xf32, #tpu.memory_space<vmem>>, vector<1x128xf32>
    %4 = vector.broadcast %3 : vector<1x128xf32> to vector<16x128xf32>
    %5 = arith.addf %2, %4 : vector<16x128xf32>
    %c0_5 = arith.constant 0 : index
    %c0_6 = arith.constant 0 : index
    %6 = vector.load %arg8[%c0_5, %c0_6] : memref<16x128xf32, #tpu.memory_space<vmem>>, vector<16x128xf32>
    tpu.vector_store %arg8[%c0_5, %c0_6], %5 {strides = array<i32>} : memref<16x128xf32, #tpu.memory_space<vmem>>, vector<16x128xf32>,
    %c0_7 = arith.constant 0 : index
    %c0_8 = arith.constant 0 : index
    %7 = vector.load %arg2[%c0_7, %c0_8] : memref<128x128xf32, #tpu.memory_space<vmem>>, vector<128x128xf32>
    %8 = tpu.iota {dimensions = array<i32: 1>} : vector<2x128xi32>
    %c64_i32 = arith.constant 64 : i32
    %9 = vector.broadcast %c64_i32 : i32 to vector<2x128xi32>
    %10 = arith.cmpi sge, %8, %9 : vector<2x128xi32>
    %c96_i32 = arith.constant 96 : i32
    %11 = vector.broadcast %c96_i32 : i32 to vector<2x128xi32>
    %12 = arith.cmpi slt, %8, %11 : vector<2x128xi32>
    %13 = arith.andi %10, %12 : vector<2x128xi1>
    %cst_9 = arith.constant 1.000000e+00 : f32
    %cst_10 = arith.constant 5.000000e-01 : f32
    %14 = vector.broadcast %cst_9 : f32 to vector<2x128xf32>
    %15 = vector.broadcast %cst_10 : f32 to vector<2x128xf32>
    %16 = arith.select %13, %14, %15 : vector<2x128xi1>, vector<2x128xf32>
    %c0_11 = arith.constant 0 : index
    %c0_12 = arith.constant 0 : index
    %17 = vector.load %arg4[%c0_11, %c0_12] : memref<2x128xf32, #tpu.memory_space<vmem>>, vector<2x128xf32>
    %c0_13 = arith.constant 0 : index
    %c0_14 = arith.constant 0 : index
    %18 = vector.load %arg5[%c0_13, %c0_14] : memref<2x128xf32, #tpu.memory_space<vmem>>, vector<2x128xf32>
    %c0_15 = arith.constant 0 : index
    %c0_16 = arith.constant 0 : index
    %19 = vector.load %arg8[%c0_15, %c0_16] : memref<16x128xf32, #tpu.memory_space<vmem>>, vector<2x128xf32>
    %cst_17 = arith.constant dense<0.000000e+00> : vector<2x128xf32>
    %20 = tpu.matmul %17, %7, %cst_17 {dimension_numbers = #tpu.dot_dimension_numbers<[1], [0], [0], [1], [0, 0, 1, 1], [], []>} : vector<2x128xf32>, vector<128x128xf32>, vector<2x128xf32> -> vector<2x128xf32>
    %21 = arith.addf %19, %20 : vector<2x128xf32>
    %22 = arith.mulf %21, %16 : vector<2x128xf32>
    %23 = math.tanh %22 : vector<2x128xf32>
    %cst_18 = arith.constant 5.000000e-01 : f32
    %24 = vector.broadcast %cst_18 : f32 to vector<2x128xf32>
    %25 = arith.mulf %24, %23 : vector<2x128xf32>
    %cst_19 = arith.constant 5.000000e-01 : f32
    %26 = vector.broadcast %cst_19 : f32 to vector<2x128xf32>
    %27 = arith.addf %25, %26 : vector<2x128xf32>
    %28 = arith.select %13, %23, %27 : vector<2x128xi1>, vector<2x128xf32>
    %c96_i32_20 = arith.constant 96 : i32
    %29 = tpu.dynamic_rotate %28 by %c96_i32_20 dim 1 : vector<2x128xf32>, i32 -> vector<2x128xf32>
    %c64_i32_21 = arith.constant 64 : i32
    %30 = tpu.dynamic_rotate %28 by %c64_i32_21 dim 1 : vector<2x128xf32>, i32 -> vector<2x128xf32>
    %c32_i32 = arith.constant 32 : i32
    %31 = tpu.dynamic_rotate %28 by %c32_i32 dim 1 : vector<2x128xf32>, i32 -> vector<2x128xf32>
    %32 = arith.mulf %29, %18 : vector<2x128xf32>
    %33 = arith.mulf %28, %30 : vector<2x128xf32>
    %34 = arith.addf %32, %33 : vector<2x128xf32>
    %35 = math.tanh %34 : vector<2x128xf32>
    %36 = arith.mulf %31, %35 : vector<2x128xf32>
    %c0_22 = arith.constant 0 : index
    %c0_23 = arith.constant 0 : index
    %37 = vector.load %arg9[%c0_22, %c0_23] : memref<16x128xf32, #tpu.memory_space<vmem>>, vector<2x128xf32>
    tpu.vector_store %arg9[%c0_22, %c0_23], %36 {strides = array<i32>} : memref<16x128xf32, #tpu.memory_space<vmem>>, vector<2x128xf32>,
    %c2 = arith.constant 2 : index
    %c0_24 = arith.constant 0 : index
    %38 = vector.load %arg8[%c2, %c0_24] : memref<16x128xf32, #tpu.memory_space<vmem>>, vector<2x128xf32>
    %cst_25 = arith.constant dense<0.000000e+00> : vector<2x128xf32>
    %39 = tpu.matmul %36, %7, %cst_25 {dimension_numbers = #tpu.dot_dimension_numbers<[1], [0], [0], [1], [0, 0, 1, 1], [], []>} : vector<2x128xf32>, vector<128x128xf32>, vector<2x128xf32> -> vector<2x128xf32>
    %40 = arith.addf %38, %39 : vector<2x128xf32>
    %41 = arith.mulf %40, %16 : vector<2x128xf32>
    %42 = math.tanh %41 : vector<2x128xf32>
    %cst_26 = arith.constant 5.000000e-01 : f32
    %43 = vector.broadcast %cst_26 : f32 to vector<2x128xf32>
    %44 = arith.mulf %43, %42 : vector<2x128xf32>
    %cst_27 = arith.constant 5.000000e-01 : f32
    %45 = vector.broadcast %cst_27 : f32 to vector<2x128xf32>
    %46 = arith.addf %44, %45 : vector<2x128xf32>
    %47 = arith.select %13, %42, %46 : vector<2x128xi1>, vector<2x128xf32>
    %c96_i32_28 = arith.constant 96 : i32
    %48 = tpu.dynamic_rotate %47 by %c96_i32_28 dim 1 : vector<2x128xf32>, i32 -> vector<2x128xf32>
    %c64_i32_29 = arith.constant 64 : i32
    %49 = tpu.dynamic_rotate %47 by %c64_i32_29 dim 1 : vector<2x128xf32>, i32 -> vector<2x128xf32>
    %c32_i32_30 = arith.constant 32 : i32
    %50 = tpu.dynamic_rotate %47 by %c32_i32_30 dim 1 : vector<2x128xf32>, i32 -> vector<2x128xf32>
    %51 = arith.mulf %48, %34 : vector<2x128xf32>
    %52 = arith.mulf %47, %49 : vector<2x128xf32>
    %53 = arith.addf %51, %52 : vector<2x128xf32>
    %54 = math.tanh %53 : vector<2x128xf32>
    %55 = arith.mulf %50, %54 : vector<2x128xf32>
    %c2_31 = arith.constant 2 : index
    %c0_32 = arith.constant 0 : index
    %56 = vector.load %arg9[%c2_31, %c0_32] : memref<16x128xf32, #tpu.memory_space<vmem>>, vector<2x128xf32>
    tpu.vector_store %arg9[%c2_31, %c0_32], %55 {strides = array<i32>} : memref<16x128xf32, #tpu.memory_space<vmem>>, vector<2x128xf32>,
    %c4 = arith.constant 4 : index
    %c0_33 = arith.constant 0 : index
    %57 = vector.load %arg8[%c4, %c0_33] : memref<16x128xf32, #tpu.memory_space<vmem>>, vector<2x128xf32>
    %cst_34 = arith.constant dense<0.000000e+00> : vector<2x128xf32>
    %58 = tpu.matmul %55, %7, %cst_34 {dimension_numbers = #tpu.dot_dimension_numbers<[1], [0], [0], [1], [0, 0, 1, 1], [], []>} : vector<2x128xf32>, vector<128x128xf32>, vector<2x128xf32> -> vector<2x128xf32>
    %59 = arith.addf %57, %58 : vector<2x128xf32>
    %60 = arith.mulf %59, %16 : vector<2x128xf32>
    %61 = math.tanh %60 : vector<2x128xf32>
    %cst_35 = arith.constant 5.000000e-01 : f32
    %62 = vector.broadcast %cst_35 : f32 to vector<2x128xf32>
    %63 = arith.mulf %62, %61 : vector<2x128xf32>
    %cst_36 = arith.constant 5.000000e-01 : f32
    %64 = vector.broadcast %cst_36 : f32 to vector<2x128xf32>
    %65 = arith.addf %63, %64 : vector<2x128xf32>
    %66 = arith.select %13, %61, %65 : vector<2x128xi1>, vector<2x128xf32>
    %c96_i32_37 = arith.constant 96 : i32
    %67 = tpu.dynamic_rotate %66 by %c96_i32_37 dim 1 : vector<2x128xf32>, i32 -> vector<2x128xf32>
    %c64_i32_38 = arith.constant 64 : i32
    %68 = tpu.dynamic_rotate %66 by %c64_i32_38 dim 1 : vector<2x128xf32>, i32 -> vector<2x128xf32>
    %c32_i32_39 = arith.constant 32 : i32
    %69 = tpu.dynamic_rotate %66 by %c32_i32_39 dim 1 : vector<2x128xf32>, i32 -> vector<2x128xf32>
    %70 = arith.mulf %67, %53 : vector<2x128xf32>
    %71 = arith.mulf %66, %68 : vector<2x128xf32>
    %72 = arith.addf %70, %71 : vector<2x128xf32>
    %73 = math.tanh %72 : vector<2x128xf32>
    %74 = arith.mulf %69, %73 : vector<2x128xf32>
    %c4_40 = arith.constant 4 : index
    %c0_41 = arith.constant 0 : index
    %75 = vector.load %arg9[%c4_40, %c0_41] : memref<16x128xf32, #tpu.memory_space<vmem>>, vector<2x128xf32>
    tpu.vector_store %arg9[%c4_40, %c0_41], %74 {strides = array<i32>} : memref<16x128xf32, #tpu.memory_space<vmem>>, vector<2x128xf32>,
    %c6 = arith.constant 6 : index
    %c0_42 = arith.constant 0 : index
    %76 = vector.load %arg8[%c6, %c0_42] : memref<16x128xf32, #tpu.memory_space<vmem>>, vector<2x128xf32>
    %cst_43 = arith.constant dense<0.000000e+00> : vector<2x128xf32>
    %77 = tpu.matmul %74, %7, %cst_43 {dimension_numbers = #tpu.dot_dimension_numbers<[1], [0], [0], [1], [0, 0, 1, 1], [], []>} : vector<2x128xf32>, vector<128x128xf32>, vector<2x128xf32> -> vector<2x128xf32>
    %78 = arith.addf %76, %77 : vector<2x128xf32>
    %79 = arith.mulf %78, %16 : vector<2x128xf32>
    %80 = math.tanh %79 : vector<2x128xf32>
    %cst_44 = arith.constant 5.000000e-01 : f32
    %81 = vector.broadcast %cst_44 : f32 to vector<2x128xf32>
    %82 = arith.mulf %81, %80 : vector<2x128xf32>
    %cst_45 = arith.constant 5.000000e-01 : f32
    %83 = vector.broadcast %cst_45 : f32 to vector<2x128xf32>
    %84 = arith.addf %82, %83 : vector<2x128xf32>
    %85 = arith.select %13, %80, %84 : vector<2x128xi1>, vector<2x128xf32>
    %c96_i32_46 = arith.constant 96 : i32
    %86 = tpu.dynamic_rotate %85 by %c96_i32_46 dim 1 : vector<2x128xf32>, i32 -> vector<2x128xf32>
    %c64_i32_47 = arith.constant 64 : i32
    %87 = tpu.dynamic_rotate %85 by %c64_i32_47 dim 1 : vector<2x128xf32>, i32 -> vector<2x128xf32>
    %c32_i32_48 = arith.constant 32 : i32
    %88 = tpu.dynamic_rotate %85 by %c32_i32_48 dim 1 : vector<2x128xf32>, i32 -> vector<2x128xf32>
    %89 = arith.mulf %86, %72 : vector<2x128xf32>
    %90 = arith.mulf %85, %87 : vector<2x128xf32>
    %91 = arith.addf %89, %90 : vector<2x128xf32>
    %92 = math.tanh %91 : vector<2x128xf32>
    %93 = arith.mulf %88, %92 : vector<2x128xf32>
    %c6_49 = arith.constant 6 : index
    %c0_50 = arith.constant 0 : index
    %94 = vector.load %arg9[%c6_49, %c0_50] : memref<16x128xf32, #tpu.memory_space<vmem>>, vector<2x128xf32>
    tpu.vector_store %arg9[%c6_49, %c0_50], %93 {strides = array<i32>} : memref<16x128xf32, #tpu.memory_space<vmem>>, vector<2x128xf32>,
    %c8 = arith.constant 8 : index
    %c0_51 = arith.constant 0 : index
    %95 = vector.load %arg8[%c8, %c0_51] : memref<16x128xf32, #tpu.memory_space<vmem>>, vector<2x128xf32>
    %cst_52 = arith.constant dense<0.000000e+00> : vector<2x128xf32>
    %96 = tpu.matmul %93, %7, %cst_52 {dimension_numbers = #tpu.dot_dimension_numbers<[1], [0], [0], [1], [0, 0, 1, 1], [], []>} : vector<2x128xf32>, vector<128x128xf32>, vector<2x128xf32> -> vector<2x128xf32>
    %97 = arith.addf %95, %96 : vector<2x128xf32>
    %98 = arith.mulf %97, %16 : vector<2x128xf32>
    %99 = math.tanh %98 : vector<2x128xf32>
    %cst_53 = arith.constant 5.000000e-01 : f32
    %100 = vector.broadcast %cst_53 : f32 to vector<2x128xf32>
    %101 = arith.mulf %100, %99 : vector<2x128xf32>
    %cst_54 = arith.constant 5.000000e-01 : f32
    %102 = vector.broadcast %cst_54 : f32 to vector<2x128xf32>
    %103 = arith.addf %101, %102 : vector<2x128xf32>
    %104 = arith.select %13, %99, %103 : vector<2x128xi1>, vector<2x128xf32>
    %c96_i32_55 = arith.constant 96 : i32
    %105 = tpu.dynamic_rotate %104 by %c96_i32_55 dim 1 : vector<2x128xf32>, i32 -> vector<2x128xf32>
    %c64_i32_56 = arith.constant 64 : i32
    %106 = tpu.dynamic_rotate %104 by %c64_i32_56 dim 1 : vector<2x128xf32>, i32 -> vector<2x128xf32>
    %c32_i32_57 = arith.constant 32 : i32
    %107 = tpu.dynamic_rotate %104 by %c32_i32_57 dim 1 : vector<2x128xf32>, i32 -> vector<2x128xf32>
    %108 = arith.mulf %105, %91 : vector<2x128xf32>
    %109 = arith.mulf %104, %106 : vector<2x128xf32>
    %110 = arith.addf %108, %109 : vector<2x128xf32>
    %111 = math.tanh %110 : vector<2x128xf32>
    %112 = arith.mulf %107, %111 : vector<2x128xf32>
    %c8_58 = arith.constant 8 : index
    %c0_59 = arith.constant 0 : index
    %113 = vector.load %arg9[%c8_58, %c0_59] : memref<16x128xf32, #tpu.memory_space<vmem>>, vector<2x128xf32>
    tpu.vector_store %arg9[%c8_58, %c0_59], %112 {strides = array<i32>} : memref<16x128xf32, #tpu.memory_space<vmem>>, vector<2x128xf32>,
    %c10 = arith.constant 10 : index
    %c0_60 = arith.constant 0 : index
    %114 = vector.load %arg8[%c10, %c0_60] : memref<16x128xf32, #tpu.memory_space<vmem>>, vector<2x128xf32>
    %cst_61 = arith.constant dense<0.000000e+00> : vector<2x128xf32>
    %115 = tpu.matmul %112, %7, %cst_61 {dimension_numbers = #tpu.dot_dimension_numbers<[1], [0], [0], [1], [0, 0, 1, 1], [], []>} : vector<2x128xf32>, vector<128x128xf32>, vector<2x128xf32> -> vector<2x128xf32>
    %116 = arith.addf %114, %115 : vector<2x128xf32>
    %117 = arith.mulf %116, %16 : vector<2x128xf32>
    %118 = math.tanh %117 : vector<2x128xf32>
    %cst_62 = arith.constant 5.000000e-01 : f32
    %119 = vector.broadcast %cst_62 : f32 to vector<2x128xf32>
    %120 = arith.mulf %119, %118 : vector<2x128xf32>
    %cst_63 = arith.constant 5.000000e-01 : f32
    %121 = vector.broadcast %cst_63 : f32 to vector<2x128xf32>
    %122 = arith.addf %120, %121 : vector<2x128xf32>
    %123 = arith.select %13, %118, %122 : vector<2x128xi1>, vector<2x128xf32>
    %c96_i32_64 = arith.constant 96 : i32
    %124 = tpu.dynamic_rotate %123 by %c96_i32_64 dim 1 : vector<2x128xf32>, i32 -> vector<2x128xf32>
    %c64_i32_65 = arith.constant 64 : i32
    %125 = tpu.dynamic_rotate %123 by %c64_i32_65 dim 1 : vector<2x128xf32>, i32 -> vector<2x128xf32>
    %c32_i32_66 = arith.constant 32 : i32
    %126 = tpu.dynamic_rotate %123 by %c32_i32_66 dim 1 : vector<2x128xf32>, i32 -> vector<2x128xf32>
    %127 = arith.mulf %124, %110 : vector<2x128xf32>
    %128 = arith.mulf %123, %125 : vector<2x128xf32>
    %129 = arith.addf %127, %128 : vector<2x128xf32>
    %130 = math.tanh %129 : vector<2x128xf32>
    %131 = arith.mulf %126, %130 : vector<2x128xf32>
    %c10_67 = arith.constant 10 : index
    %c0_68 = arith.constant 0 : index
    %132 = vector.load %arg9[%c10_67, %c0_68] : memref<16x128xf32, #tpu.memory_space<vmem>>, vector<2x128xf32>
    tpu.vector_store %arg9[%c10_67, %c0_68], %131 {strides = array<i32>} : memref<16x128xf32, #tpu.memory_space<vmem>>, vector<2x128xf32>,
    %c12 = arith.constant 12 : index
    %c0_69 = arith.constant 0 : index
    %133 = vector.load %arg8[%c12, %c0_69] : memref<16x128xf32, #tpu.memory_space<vmem>>, vector<2x128xf32>
    %cst_70 = arith.constant dense<0.000000e+00> : vector<2x128xf32>
    %134 = tpu.matmul %131, %7, %cst_70 {dimension_numbers = #tpu.dot_dimension_numbers<[1], [0], [0], [1], [0, 0, 1, 1], [], []>} : vector<2x128xf32>, vector<128x128xf32>, vector<2x128xf32> -> vector<2x128xf32>
    %135 = arith.addf %133, %134 : vector<2x128xf32>
    %136 = arith.mulf %135, %16 : vector<2x128xf32>
    %137 = math.tanh %136 : vector<2x128xf32>
    %cst_71 = arith.constant 5.000000e-01 : f32
    %138 = vector.broadcast %cst_71 : f32 to vector<2x128xf32>
    %139 = arith.mulf %138, %137 : vector<2x128xf32>
    %cst_72 = arith.constant 5.000000e-01 : f32
    %140 = vector.broadcast %cst_72 : f32 to vector<2x128xf32>
    %141 = arith.addf %139, %140 : vector<2x128xf32>
    %142 = arith.select %13, %137, %141 : vector<2x128xi1>, vector<2x128xf32>
    %c96_i32_73 = arith.constant 96 : i32
    %143 = tpu.dynamic_rotate %142 by %c96_i32_73 dim 1 : vector<2x128xf32>, i32 -> vector<2x128xf32>
    %c64_i32_74 = arith.constant 64 : i32
    %144 = tpu.dynamic_rotate %142 by %c64_i32_74 dim 1 : vector<2x128xf32>, i32 -> vector<2x128xf32>
    %c32_i32_75 = arith.constant 32 : i32
    %145 = tpu.dynamic_rotate %142 by %c32_i32_75 dim 1 : vector<2x128xf32>, i32 -> vector<2x128xf32>
    %146 = arith.mulf %143, %129 : vector<2x128xf32>
    %147 = arith.mulf %142, %144 : vector<2x128xf32>
    %148 = arith.addf %146, %147 : vector<2x128xf32>
    %149 = math.tanh %148 : vector<2x128xf32>
    %150 = arith.mulf %145, %149 : vector<2x128xf32>
    %c12_76 = arith.constant 12 : index
    %c0_77 = arith.constant 0 : index
    %151 = vector.load %arg9[%c12_76, %c0_77] : memref<16x128xf32, #tpu.memory_space<vmem>>, vector<2x128xf32>
    tpu.vector_store %arg9[%c12_76, %c0_77], %150 {strides = array<i32>} : memref<16x128xf32, #tpu.memory_space<vmem>>, vector<2x128xf32>,
    %c14 = arith.constant 14 : index
    %c0_78 = arith.constant 0 : index
    %152 = vector.load %arg8[%c14, %c0_78] : memref<16x128xf32, #tpu.memory_space<vmem>>, vector<2x128xf32>
    %cst_79 = arith.constant dense<0.000000e+00> : vector<2x128xf32>
    %153 = tpu.matmul %150, %7, %cst_79 {dimension_numbers = #tpu.dot_dimension_numbers<[1], [0], [0], [1], [0, 0, 1, 1], [], []>} : vector<2x128xf32>, vector<128x128xf32>, vector<2x128xf32> -> vector<2x128xf32>
    %154 = arith.addf %152, %153 : vector<2x128xf32>
    %155 = arith.mulf %154, %16 : vector<2x128xf32>
    %156 = math.tanh %155 : vector<2x128xf32>
    %cst_80 = arith.constant 5.000000e-01 : f32
    %157 = vector.broadcast %cst_80 : f32 to vector<2x128xf32>
    %158 = arith.mulf %157, %156 : vector<2x128xf32>
    %cst_81 = arith.constant 5.000000e-01 : f32
    %159 = vector.broadcast %cst_81 : f32 to vector<2x128xf32>
    %160 = arith.addf %158, %159 : vector<2x128xf32>
    %161 = arith.select %13, %156, %160 : vector<2x128xi1>, vector<2x128xf32>
    %c96_i32_82 = arith.constant 96 : i32
    %162 = tpu.dynamic_rotate %161 by %c96_i32_82 dim 1 : vector<2x128xf32>, i32 -> vector<2x128xf32>
    %c64_i32_83 = arith.constant 64 : i32
    %163 = tpu.dynamic_rotate %161 by %c64_i32_83 dim 1 : vector<2x128xf32>, i32 -> vector<2x128xf32>
    %c32_i32_84 = arith.constant 32 : i32
    %164 = tpu.dynamic_rotate %161 by %c32_i32_84 dim 1 : vector<2x128xf32>, i32 -> vector<2x128xf32>
    %165 = arith.mulf %162, %148 : vector<2x128xf32>
    %166 = arith.mulf %161, %163 : vector<2x128xf32>
    %167 = arith.addf %165, %166 : vector<2x128xf32>
    %168 = math.tanh %167 : vector<2x128xf32>
    %169 = arith.mulf %164, %168 : vector<2x128xf32>
    %c14_85 = arith.constant 14 : index
    %c0_86 = arith.constant 0 : index
    %170 = vector.load %arg9[%c14_85, %c0_86] : memref<16x128xf32, #tpu.memory_space<vmem>>, vector<2x128xf32>
    tpu.vector_store %arg9[%c14_85, %c0_86], %169 {strides = array<i32>} : memref<16x128xf32, #tpu.memory_space<vmem>>, vector<2x128xf32>,
    %c0_87 = arith.constant 0 : index
    %c0_88 = arith.constant 0 : index
    %171 = vector.load %arg9[%c0_87, %c0_88] : memref<16x128xf32, #tpu.memory_space<vmem>>, vector<16x128xf32>
    %172 = vector.extract_strided_slice %171 {offsets = [0, 0], sizes = [16, 32], strides = [1, 1]} : vector<16x128xf32> to vector<16x32xf32>
    %c0_89 = arith.constant 0 : index
    %c0_90 = arith.constant 0 : index
    %173 = vector.load %arg6[%c0_89, %c0_90] : memref<16x32xf32, #tpu.memory_space<vmem>>, vector<16x32xf32>
    tpu.vector_store %arg6[%c0_89, %c0_90], %172 {strides = array<i32>} : memref<16x32xf32, #tpu.memory_space<vmem>>, vector<16x32xf32>,
    %174 = vector.extract_strided_slice %167 {offsets = [0, 0], sizes = [2, 32], strides = [1, 1]} : vector<2x128xf32> to vector<2x32xf32>
    %c0_91 = arith.constant 0 : index
    %c0_92 = arith.constant 0 : index
    %175 = vector.load %arg7[%c0_91, %c0_92] : memref<2x32xf32, #tpu.memory_space<vmem>>, vector<2x32xf32>
    tpu.vector_store %arg7[%c0_91, %c0_92], %174 {strides = array<i32>} : memref<2x32xf32, #tpu.memory_space<vmem>>, vector<2x32xf32>,
    return
  }
}

</mosaic_0001>

<bundles_post_ra>
// kernel: tpu_custom_call.1
= control target key start
LH: loop header
LB: loop body
LE: loop exit
PB: predicated region body
PF: predicated region fallthrough
CT: control target
= control target key end

     0   :  { %13 = vsyncpa [#allocation5], 0  ;;  %s2090_s0 = inlined_call_operand.hbm [shape: f32[16,16], index: 0, kind: input, shape index: {}]   ;;  %s2091_s1 = inlined_call_operand.hbm [shape: f32[16,128], index: 1, kind: input, shape index: {}]   ;;  %s2092_s2 = inlined_call_operand.hbm [shape: f32[128,128], index: 2, kind: input, shape index: {}]   ;;  %s2093_s3 = inlined_call_operand.vmem [shape: f32[1,128], index: 3, kind: input, shape index: {}]   ;;  %s2094_s4 = inlined_call_operand.vmem [shape: f32[2,128], index: 4, kind: input, shape index: {}]   ;;  %s2095_s5 = inlined_call_operand.vmem [shape: f32[2,128], index: 5, kind: input, shape index: {}]   ;;  %s2096_s6 = inlined_call_operand.hbm [shape: f32[16,32], index: 6, kind: output, shape index: {0}]   ;;  %s2097_s7 = inlined_call_operand.hbm [shape: f32[2,32], index: 7, kind: output, shape index: {1}]  }
   0x1   :  { %14 = vsyncpa [#allocation8], 0 }
   0x2   :  { %15 = vsyncpa [#allocation6], 0 }
   0x3   :  { %16 = vsyncpa [#allocation12], 0  ;;  %s1728_s24 = smov [#allocation7]   ;;  %s1729_s26 = smov [#allocation4]  }
   0x4   :  { %s34_s25 = sshll.u32 %s1728_s24, 4  ;;  %s22_s27 = sshll.u32 %s1729_s26, 4  ;;  %s35_s25 = int_to_ptr.vmem [resolvable:$true] %s34_s25  ;;  %s1782_s27 = int_to_ptr.vmem [resolvable:$true] %s22_s27 }
   0x5   :  { %s1610_s30 = scalar_lea.hbm %s2091_s1, 256 }
   0x6   :  { %p1611_p0 = scmp.ne.s32.totalorder %s2091_s1, %s1610_s30  ;;  %p1614_p1 = scmp.lt.u32.totalorder %s1610_s30, %s2091_s1 }
   0x8   :  { %p1616_p2 = pnand %p1614_p1, %p1611_p0 }
   0xa   :  { %1619 = shalt.err (!%p1616_p2)
}
   0xb   :  { %s1620_s12 = scalar_lea.vmem %s35_s25, 256  ;;  %p1625_p4 = scmp.lt.s32.totalorder %s35_s25, %s35_s25 }
   0xc   :  { %p1621_p3 = scmp.ne.s32.totalorder %s35_s25, %s1620_s12  ;;  %p1626_p5 = scmp.lt.s32.totalorder %s1620_s12, %s1620_s12 }
   0xe   :  { %p1627_p6 = por %p1626_p5, %p1625_p4 }
  0x10   :  { %p1628_p7 = pnand %p1627_p6, %p1621_p3 }
  0x12   :  { %1631 = shalt.err (!%p1628_p7)
}
  0x13   :  { %s1730_s13 = smov 128   ;;  %s1731_s14 = smov 8  }
  0x14   :  { %40 = dma.hbm_to_vmem [thread:$0]  %s2091_s1, 256, %s35_s25, [#allocation8], %s1730_s13, %s1730_s13, %s1731_s14  }
  0x15   :  { %s1632_s19 = scalar_lea.hbm %s2090_s0, 256 }
  0x16   :  { %p1633_p8 = scmp.ne.s32.totalorder %s2090_s0, %s1632_s19  ;;  %p1636_p9 = scmp.lt.u32.totalorder %s1632_s19, %s2090_s0 }
  0x18   :  { %p1638_p10 = pnand %p1636_p9, %p1633_p8 }
  0x1a   :  { %1641 = shalt.err (!%p1638_p10)
}
  0x1b   :  { %s1642_s24 = scalar_lea.vmem %s1782_s27, 256  ;;  %p1647_p12 = scmp.lt.s32.totalorder %s1782_s27, %s1782_s27 }
  0x1c   :  { %p1643_p11 = scmp.ne.s32.totalorder %s1782_s27, %s1642_s24  ;;  %p1648_p13 = scmp.lt.s32.totalorder %s1642_s24, %s1642_s24 }
  0x1e   :  { %p1649_p0 = por %p1648_p13, %p1647_p12 }
  0x20   :  { %p1650_p1 = pnand %p1649_p0, %p1643_p11 }
  0x22   :  { %1653 = shalt.err (!%p1650_p1)
}
  0x23   :  { %28 = dma.hbm_to_vmem [thread:$0]  %s2090_s0, 256, %s1782_s27, [#allocation5], %s1730_s13, %s1730_s13, %s1731_s14  }
  0x24   :  { %s1732_s26 = smov [#allocation9]   ;;  %s1654_s8 = scalar_lea.hbm %s2092_s2, 2048 }
  0x25   :  { %s46_s28 = sshll.u32 %s1732_s26, 4  ;;  %p1655_p2 = scmp.ne.s32.totalorder %s2092_s2, %s1654_s8  ;;  %s47_s28 = int_to_ptr.vmem [resolvable:$true] %s46_s28 }
  0x26   :  { %p1658_p3 = scmp.lt.u32.totalorder %s1654_s8, %s2092_s2 }
  0x28   :  { %p1660_p4 = pnand %p1658_p3, %p1655_p2 }
  0x2a   :  { %1663 = shalt.err (!%p1660_p4)
}
  0x2b   :  { %s1664_s15 = scalar_lea.vmem %s47_s28, 2048  ;;  %p1669_p6 = scmp.lt.s32.totalorder %s47_s28, %s47_s28 }
  0x2c   :  { %p1665_p5 = scmp.ne.s32.totalorder %s47_s28, %s1664_s15  ;;  %p1670_p7 = scmp.lt.s32.totalorder %s1664_s15, %s1664_s15 }
  0x2e   :  { %p1671_p8 = por %p1670_p7, %p1669_p6 }
  0x30   :  { %p1672_p9 = pnand %p1671_p8, %p1665_p5 }
  0x32   :  { %1675 = shalt.err (!%p1672_p9)
}
  0x33   :  { %52 = dma.hbm_to_vmem [thread:$0]  %s2092_s2, 2048, %s47_s28, [#allocation8], %s1730_s13, %s1730_s13, %s1731_s14  }
  0x34   :  { %1720 = dma.done.wait [#allocation5], 256  }
  0x35   :  { %1721 = vsyncadd [#allocation5], 4294967040 }
  0x36   :  { %1722 = dma.done.wait [#allocation8], 2304  }
  0x37   :  { %1723 = vsyncadd [#allocation8], 4294964992  ;;  %v1733_v0 = vmov 0.0|0.0   ;;  %vm1734_vm0 = vmmov 0   ;;  %v1735_v1 = vmov 0.0   ;;  %v163_v2 = vld [vmem:[#allocation9] sm:$0xff]  ;;  %v179_v37 = vlaneseq }
  0x38   :  { %1372 = vmatprep.subr.bf16.mxu1 %v1733_v0  ;;  %1120 = vmatprep.mubr.msk.f32.mxu1 %vm1734_vm0, %v1735_v1  ;;  %v164_v3 = vld [vmem:[#allocation9 + $0x8] sm:$0xff]  ;;  %v165_v4 = vld [vmem:[#allocation9 + $0x10] sm:$0xff]  ;;  %v166_v6 = vld [vmem:[#allocation9 + $0x18] sm:$0xff]  ;;  %vm79_vm1 = vcmask 130048   ;;  %v1736_v41 = vmov 0.5   ;;  %s1738_s18 = smov 96  }
  0x39   :  { %v1837_v5 = vpack.c.bf16 %v164_v3, %v163_v2  ;;  %v70_v7 = vld [vmem:[#allocation7] sm:$0xff]  ;;  %v1840_v8 = vpack.c.bf16 %v166_v6, %v165_v4  ;;  %v71_v9 = vld [vmem:[#allocation7 + $0x8] sm:$0xff]  ;;  %v167_v10 = vld [vmem:[#allocation9 + $0x20] sm:$0xff]  ;;  %v180_v38 = vand.u32 127, %v179_v37  ;;  %s1739_s19 = smov 64   ;;  %vm901_vm5 = vcmask 261120  }
  0x3a   :  { %v168_v11 = vld [vmem:[#allocation9 + $0x28] sm:$0xff]  ;;  %v1368_v12 = vpack.c.bf16 %v71_v9, %v70_v7  ;;  %v68_v13 = vld [vmem:[#allocation4] sm:$0xff]  ;;  %v169_v16 = vld [vmem:[#allocation9 + $0x30] sm:$0xff]  ;;  %vm904_vm6 = vcmask 254976  }
  0x3b   :  { %1374 = vmatpush3.bf16.msra.mxu1 %v1837_v5  ;;  %1085 = vmatprep.mubr.msk.f32.mxu0 %vm79_vm1, %v68_v13  ;;  %v1845_v14 = vpack.c.bf16 %v168_v11, %v167_v10  ;;  %v69_v15 = vld [vmem:[#allocation4 + $0x8] sm:$0xff]  ;;  %v170_v17 = vld [vmem:[#allocation9 + $0x38] sm:$0xff]  ;;  %v171_v19 = vld [vmem:[#allocation9 + $0x40] sm:$0xff]  ;;  %vm181_vm2 = vcmp.ge.s32.totalorder %v180_v38, 64  ;;  %vm182_vm3 = vcmp.lt.s32.totalorder %v180_v38, 96 }
  0x3c   :  { %1375 = vmatprep.subr.bf16.mxu1 %v1733_v0  ;;  %1369 = vmatprep.subr.bf16.mxu0 %v1368_v12  ;;  %v1851_v18 = vpack.c.bf16 %v170_v17, %v169_v16  ;;  %v172_v20 = vld [vmem:[#allocation9 + $0x48] sm:$0xff]  ;;  %v173_v22 = vld [vmem:[#allocation9 + $0x50] sm:$0xff]  ;;  %v174_v23 = vld [vmem:[#allocation9 + $0x58] sm:$0xff] }
  0x3d   :  { %1371 = vmatpush3.bf16.msra.mxu0 %v1368_v12  ;;  %v1859_v21 = vpack.c.bf16 %v172_v20, %v171_v19  ;;  %v1865_v24 = vpack.c.bf16 %v174_v23, %v173_v22  ;;  %v175_v25 = vld [vmem:[#allocation9 + $0x60] sm:$0xff]  ;;  %v176_v26 = vld [vmem:[#allocation9 + $0x68] sm:$0xff]  ;;  %v177_v28 = vld [vmem:[#allocation9 + $0x70] sm:$0xff] }
  0x3e   :  { %1396 = vmatprep.subr.bf16.mxu0 %v1733_v0  ;;  %v1871_v27 = vpack.c.bf16 %v176_v26, %v175_v25  ;;  %v178_v29 = vld [vmem:[#allocation9 + $0x78] sm:$0xff]  ;;  %v185_v31 = vld [vmem:[%s2094_s4] sm:$0x3]  ;;  %vm1914_vm4 = vmand %vm181_vm2, %vm182_vm3 }
  0x3f   :  { %1377 = vmatpush3.bf16.msra.mxu1 %v1840_v8  ;;  %v1877_v30 = vpack.c.bf16 %v178_v29, %v177_v28  ;;  %v938_v32 = vld [vmem:[%s2093_s3] ss:$0 sm:$0xff]  ;;  %v1920_v42 = vsel %vm1914_vm4, 1.0, %v1736_v41  ;;  %s1737_s3 = smov 32  }
  0x40   :  { %1378 = vmatprep.subr.bf16.mxu1 %v1733_v0  ;;  %1086 = vmatmul.mubr.msk.f32.vlgmr.msra.gmra.mrb[0].mxu0 %vm79_vm1, %v69_v15  ;;  %v186_v52 = vld [vmem:[%s2095_s5] sm:$0x3]  ;;  %s1740_s5 = smov [#allocation11]  }
  0x41   :  { %1398 = vmatpush3.bf16.msra.mxu0 %v1837_v5  ;;  %1155 = vmatprep.mubr.msk.f32.mxu0 %vm1734_vm0, %v1735_v1  ;;  %s924_s22 = sshll.u32 %s1740_s5, 4  ;;  %s925_s22 = int_to_ptr.vmem [resolvable:$true] %s924_s22 }
  0x42   :  { %1399 = vmatprep.subr.bf16.mxu0 %v1733_v0  ;;  %s1676_s23 = scalar_lea.vmem %s925_s22, 32  ;;  %p1681_p11 = scmp.lt.s32.totalorder %s925_s22, %s925_s22 }
  0x43   :  { %1380 = vmatpush3.bf16.msra.mxu1 %v1845_v14  ;;  %p1677_p10 = scmp.ne.s32.totalorder %s925_s22, %s1676_s23  ;;  %p1682_p12 = scmp.lt.s32.totalorder %s1676_s23, %s1676_s23 }
  0x44   :  { %1381 = vmatprep.subr.bf16.mxu1 %v1733_v0 }
  0x45   :  { %1401 = vmatpush3.bf16.msra.mxu0 %v1840_v8  ;;  %p1683_p13 = por %p1682_p12, %p1681_p11 }
  0x46   :  { %1402 = vmatprep.subr.bf16.mxu0 %v1733_v0 }
  0x47   :  { %1383 = vmatpush3.bf16.msra.mxu1 %v1851_v18  ;;  %p1684_p0 = pnand %p1683_p13, %p1677_p10 }
  0x48   :  { %1384 = vmatprep.subr.bf16.mxu1 %v1733_v0 }
  0x49   :  { %1404 = vmatpush3.bf16.msra.mxu0 %v1845_v14 }
  0x4a   :  { %1405 = vmatprep.subr.bf16.mxu0 %v1733_v0 }
  0x4b   :  { %1386 = vmatpush3.bf16.msra.mxu1 %v1859_v21 }
  0x4c   :  { %1387 = vmatprep.subr.bf16.mxu1 %v1733_v0 }
  0x4d   :  { %1407 = vmatpush3.bf16.msra.mxu0 %v1851_v18 }
  0x4e   :  { %1408 = vmatprep.subr.bf16.mxu0 %v1733_v0 }
  0x4f   :  { %1389 = vmatpush3.bf16.msra.mxu1 %v1865_v24 }
  0x50   :  { %1390 = vmatprep.subr.bf16.mxu1 %v1733_v0 }
  0x51   :  { %1410 = vmatpush3.bf16.msra.mxu0 %v1859_v21 }
  0x52   :  { %1411 = vmatprep.subr.bf16.mxu0 %v1733_v0 }
  0x53   :  { %1392 = vmatpush3.bf16.msra.mxu1 %v1871_v27 }
  0x54   :  { %1393 = vmatprep.subr.bf16.mxu1 %v1733_v0 }
  0x55   :  { %1413 = vmatpush3.bf16.msra.mxu0 %v1865_v24 }
  0x56   :  { %1414 = vmatprep.subr.bf16.mxu0 %v1733_v0 }
  0x57   :  { %1395 = vmatpush3.bf16.msra.mxu1 %v1877_v30 }
  0x58   :  { %1420 = vmatprep.subr.bf16.mxu1 %v1733_v0 }
  0x59   :  { %1416 = vmatpush3.bf16.msra.mxu0 %v1871_v27 }
  0x5a   :  { %1121 = vmatmul.mubr.f32.vlgmr.msra.gmra.mrb[0].mxu1 %v185_v31  ;;  %1417 = vmatprep.subr.bf16.mxu0 %v1733_v0 }
  0x5b   :  { %1422 = vmatpush3.bf16.msra.mxu1 %v1837_v5  ;;  %1190 = vmatprep.mubr.msk.f32.mxu1 %vm1734_vm0, %v1735_v1 }
  0x5c   :  { %1423 = vmatprep.subr.bf16.mxu1 %v1733_v0 }
  0x5d   :  { %1419 = vmatpush3.bf16.msra.mxu0 %v1877_v30 }
  0x5e   :  { %1444 = vmatprep.subr.bf16.mxu0 %v1733_v0 }
  0x5f   :  { %1425 = vmatpush3.bf16.msra.mxu1 %v1840_v8 }
  0x60   :  { %1426 = vmatprep.subr.bf16.mxu1 %v1733_v0 }
  0x63   :  { %1428 = vmatpush3.bf16.msra.mxu1 %v1845_v14 }
  0x64   :  { %1429 = vmatprep.subr.bf16.mxu1 %v1733_v0 }
  0x67   :  { %1431 = vmatpush3.bf16.msra.mxu1 %v1851_v18 }
  0x68   :  { %1432 = vmatprep.subr.bf16.mxu1 %v1733_v0 }
  0x6b   :  { %1434 = vmatpush3.bf16.msra.mxu1 %v1859_v21 }
  0x6c   :  { %1435 = vmatprep.subr.bf16.mxu1 %v1733_v0 }
  0x6f   :  { %1437 = vmatpush3.bf16.msra.mxu1 %v1865_v24 }
  0x70   :  { %1438 = vmatprep.subr.bf16.mxu1 %v1733_v0 }
  0x73   :  { %1440 = vmatpush3.bf16.msra.mxu1 %v1871_v27 }
  0x74   :  { %1441 = vmatprep.subr.bf16.mxu1 %v1733_v0 }
  0x77   :  { %1443 = vmatpush3.bf16.msra.mxu1 %v1877_v30 }
  0x78   :  { %1468 = vmatprep.subr.bf16.mxu1 %v1733_v0 }
 0x113   :  { %v1087_v33 = vpop.f32.mrb[0].mxu0 }
 0x114   :  { %v158_v34 = vadd.f32 %v1087_v33, %v938_v32  ;;  %v152_v35 = vpop.f32.mrb[1].mxu0 }
 0x115   :  { %v153_v36 = vadd.f32 %v938_v32, %v152_v35 }
 0x116   :  { %162 = vst [vmem:[#allocation2 + $0x8] sm:$0xff] %v158_v34 }
 0x117   :  { %161 = vst [vmem:[#allocation2] sm:$0xff] %v153_v36 }
 0x11e   :  { %v187_v40 = vld [vmem:[#allocation2] sm:$0x3]  ;;  %v276_v60 = vld [vmem:[#allocation2 + $0x2] sm:$0x3]  ;;  %v365_v19 = vld [vmem:[#allocation2 + $0x4] sm:$0x3] }
 0x11f   :  { %v454_v41 = vld [vmem:[#allocation2 + $0x6] sm:$0x3] }
 0x12d   :  { %v254_v43 = vpop.f32.mrb[0].mxu1 }
 0x12e   :  { %v258_v44 = vadd.f32 %v254_v43, %v187_v40  ;;  %v1122_v45 = vpop.f32.mrb[1].mxu1 }
 0x130   :  { %v259_v46 = vmul.f32 %v258_v44, %v1920_v42 }
 0x132   :  { %1578 = vtanh.f32 %v259_v46 }
 0x13c   :  { %v1579_v47 = vpop.eup %1578 }
 0x13d   :  { %v261_v48 = vmul.f32 0.5, %v1579_v47 }
 0x13f   :  { %v262_v49 = vadd.f32 0.5, %v261_v48 }
 0x141   :  { %v263_v50 = vsel %vm1914_vm4, %v1579_v47, %v262_v49 }
 0x142   :  { %268 = vrot.lane.b32.xlu1 %v263_v50, %s1737_s3  ;;  %264 = vrot.lane.b32.xlu0 %v263_v50, %s1738_s18 }
 0x146   :  { %266 = vrot.lane.b32.xlu0 %v263_v50, %s1739_s19 }
 0x1b4   :  { %v265_v51 = vpop.permute.xlu0 %264  ;;  %v269_v58 = vpop.permute.xlu1 %268 }
 0x1b5   :  { %v270_v54 = vmul.f32 %v265_v51, %v186_v52 }
 0x1b8   :  { %v267_v53 = vpop.permute.xlu0 %266 }
 0x1b9   :  { %v271_v55 = vmul.f32 %v267_v53, %v263_v50 }
 0x1bb   :  { %v272_v56 = vadd.f32 %v271_v55, %v270_v54 }
 0x1bd   :  { %1580 = vtanh.f32 %v272_v56 }
 0x1c7   :  { %v1581_v57 = vpop.eup %1580 }
 0x1c8   :  { %v274_v59 = vmul.f32 %v1581_v57, %v269_v58 }
 0x1ca   :  { %275 = vst [vmem:[#allocation3] sm:$0x3] %v274_v59  ;;  %1156 = vmatmul.mubr.f32.vlgmr.msra.gmra.mrb[2].mxu0 %v274_v59 }
 0x1cb   :  { %1446 = vmatpush3.bf16.msra.mxu0 %v1837_v5  ;;  %1225 = vmatprep.mubr.msk.f32.mxu0 %vm1734_vm0, %v1735_v1 }
 0x1cc   :  { %1447 = vmatprep.subr.bf16.mxu0 %v1733_v0 }
 0x1cf   :  { %1449 = vmatpush3.bf16.msra.mxu0 %v1840_v8 }
 0x1d0   :  { %1450 = vmatprep.subr.bf16.mxu0 %v1733_v0 }
 0x1d3   :  { %1452 = vmatpush3.bf16.msra.mxu0 %v1845_v14 }
 0x1d4   :  { %1453 = vmatprep.subr.bf16.mxu0 %v1733_v0 }
 0x1d7   :  { %1455 = vmatpush3.bf16.msra.mxu0 %v1851_v18 }
 0x1d8   :  { %1456 = vmatprep.subr.bf16.mxu0 %v1733_v0 }
 0x1db   :  { %1458 = vmatpush3.bf16.msra.mxu0 %v1859_v21 }
 0x1dc   :  { %1459 = vmatprep.subr.bf16.mxu0 %v1733_v0 }
 0x1df   :  { %1461 = vmatpush3.bf16.msra.mxu0 %v1865_v24 }
 0x1e0   :  { %1462 = vmatprep.subr.bf16.mxu0 %v1733_v0 }
 0x1e3   :  { %1464 = vmatpush3.bf16.msra.mxu0 %v1871_v27 }
 0x1e4   :  { %1465 = vmatprep.subr.bf16.mxu0 %v1733_v0 }
 0x1e7   :  { %1467 = vmatpush3.bf16.msra.mxu0 %v1877_v30 }
 0x1e8   :  { %1492 = vmatprep.subr.bf16.mxu0 %v1733_v0 }
 0x29d   :  { %v343_v61 = vpop.f32.mrb[2].mxu0 }
 0x29e   :  { %v347_v62 = vadd.f32 %v343_v61, %v276_v60  ;;  %v1157_v63 = vpop.f32.mrb[3].mxu0  ;;  %v543_v60 = vld [vmem:[#allocation2 + $0x8] sm:$0x3] }
 0x2a0   :  { %v348_v2 = vmul.f32 %v347_v62, %v1920_v42 }
 0x2a2   :  { %1582 = vtanh.f32 %v348_v2 }
 0x2ac   :  { %v1583_v3 = vpop.eup %1582 }
 0x2ad   :  { %v350_v4 = vmul.f32 0.5, %v1583_v3 }
 0x2af   :  { %v351_v6 = vadd.f32 0.5, %v350_v4 }
 0x2b1   :  { %v352_v7 = vsel %vm1914_vm4, %v1583_v3, %v351_v6 }
 0x2b2   :  { %355 = vrot.lane.b32.xlu0 %v352_v7, %s1739_s19  ;;  %353 = vrot.lane.b32.xlu1 %v352_v7, %s1738_s18 }
 0x2b6   :  { %357 = vrot.lane.b32.xlu1 %v352_v7, %s1737_s3 }
 0x324   :  { %v356_v9 = vpop.permute.xlu0 %355  ;;  %v354_v10 = vpop.permute.xlu1 %353 }
 0x325   :  { %v360_v11 = vmul.f32 %v356_v9, %v352_v7  ;;  %v359_v12 = vmul.f32 %v354_v10, %v272_v56 }
 0x327   :  { %v361_v13 = vadd.f32 %v360_v11, %v359_v12 }
 0x328   :  { %v358_v16 = vpop.permute.xlu1 %357 }
 0x329   :  { %1584 = vtanh.f32 %v361_v13 }
 0x333   :  { %v1585_v15 = vpop.eup %1584 }
 0x334   :  { %v363_v17 = vmul.f32 %v1585_v15, %v358_v16 }
 0x336   :  { %364 = vst [vmem:[#allocation3 + $0x2] sm:$0x3] %v363_v17  ;;  %1191 = vmatmul.mubr.f32.vlgmr.msra.gmra.mrb[2].mxu1 %v363_v17 }
 0x337   :  { %1470 = vmatpush3.bf16.msra.mxu1 %v1837_v5  ;;  %1260 = vmatprep.mubr.msk.f32.mxu1 %vm1734_vm0, %v1735_v1 }
 0x338   :  { %1471 = vmatprep.subr.bf16.mxu1 %v1733_v0 }
 0x33b   :  { %1473 = vmatpush3.bf16.msra.mxu1 %v1840_v8 }
 0x33c   :  { %1474 = vmatprep.subr.bf16.mxu1 %v1733_v0 }
 0x33f   :  { %1476 = vmatpush3.bf16.msra.mxu1 %v1845_v14 }
 0x340   :  { %1477 = vmatprep.subr.bf16.mxu1 %v1733_v0 }
 0x343   :  { %1479 = vmatpush3.bf16.msra.mxu1 %v1851_v18 }
 0x344   :  { %1480 = vmatprep.subr.bf16.mxu1 %v1733_v0 }
 0x347   :  { %1482 = vmatpush3.bf16.msra.mxu1 %v1859_v21 }
 0x348   :  { %1483 = vmatprep.subr.bf16.mxu1 %v1733_v0 }
 0x34b   :  { %1485 = vmatpush3.bf16.msra.mxu1 %v1865_v24 }
 0x34c   :  { %1486 = vmatprep.subr.bf16.mxu1 %v1733_v0 }
 0x34f   :  { %1488 = vmatpush3.bf16.msra.mxu1 %v1871_v27 }
 0x350   :  { %1489 = vmatprep.subr.bf16.mxu1 %v1733_v0 }
 0x353   :  { %1491 = vmatpush3.bf16.msra.mxu1 %v1877_v30 }
 0x354   :  { %1516 = vmatprep.subr.bf16.mxu1 %v1733_v0 }
 0x409   :  { %v432_v20 = vpop.f32.mrb[2].mxu1 }
 0x40a   :  { %v436_v22 = vadd.f32 %v432_v20, %v365_v19  ;;  %v1192_v23 = vpop.f32.mrb[3].mxu1 }
 0x40c   :  { %v437_v25 = vmul.f32 %v436_v22, %v1920_v42 }
 0x40e   :  { %1586 = vtanh.f32 %v437_v25 }
 0x418   :  { %v1587_v26 = vpop.eup %1586 }
 0x419   :  { %v439_v28 = vmul.f32 0.5, %v1587_v26 }
 0x41b   :  { %v440_v29 = vadd.f32 0.5, %v439_v28 }
 0x41d   :  { %v441_v31 = vsel %vm1914_vm4, %v1587_v26, %v440_v29  ;;  %v721_v29 = vld [vmem:[#allocation2 + $0xc] sm:$0x3] }
 0x41e   :  { %444 = vrot.lane.b32.xlu1 %v441_v31, %s1739_s19  ;;  %442 = vrot.lane.b32.xlu0 %v441_v31, %s1738_s18 }
 0x422   :  { %446 = vrot.lane.b32.xlu0 %v441_v31, %s1737_s3 }
 0x490   :  { %v445_v32 = vpop.permute.xlu1 %444  ;;  %v443_v33 = vpop.permute.xlu0 %442 }
 0x491   :  { %v449_v34 = vmul.f32 %v445_v32, %v441_v31  ;;  %v448_v35 = vmul.f32 %v443_v33, %v361_v13 }
 0x493   :  { %v450_v36 = vadd.f32 %v449_v34, %v448_v35 }
 0x494   :  { %v447_v38 = vpop.permute.xlu0 %446 }
 0x495   :  { %1588 = vtanh.f32 %v450_v36 }
 0x49f   :  { %v1589_v37 = vpop.eup %1588 }
 0x4a0   :  { %v452_v40 = vmul.f32 %v1589_v37, %v447_v38 }
 0x4a2   :  { %453 = vst [vmem:[#allocation3 + $0x4] sm:$0x3] %v452_v40  ;;  %1226 = vmatmul.mubr.f32.vlgmr.msra.gmra.mrb[4].mxu0 %v452_v40 }
 0x4a3   :  { %1494 = vmatpush3.bf16.msra.mxu0 %v1837_v5  ;;  %1295 = vmatprep.mubr.msk.f32.mxu0 %vm1734_vm0, %v1735_v1 }
 0x4a4   :  { %1495 = vmatprep.subr.bf16.mxu0 %v1733_v0 }
 0x4a7   :  { %1497 = vmatpush3.bf16.msra.mxu0 %v1840_v8 }
 0x4a8   :  { %1498 = vmatprep.subr.bf16.mxu0 %v1733_v0 }
 0x4ab   :  { %1500 = vmatpush3.bf16.msra.mxu0 %v1845_v14 }
 0x4ac   :  { %1501 = vmatprep.subr.bf16.mxu0 %v1733_v0 }
 0x4af   :  { %1503 = vmatpush3.bf16.msra.mxu0 %v1851_v18 }
 0x4b0   :  { %1504 = vmatprep.subr.bf16.mxu0 %v1733_v0 }
 0x4b3   :  { %1506 = vmatpush3.bf16.msra.mxu0 %v1859_v21 }
 0x4b4   :  { %1507 = vmatprep.subr.bf16.mxu0 %v1733_v0 }
 0x4b7   :  { %1509 = vmatpush3.bf16.msra.mxu0 %v1865_v24 }
 0x4b8   :  { %1510 = vmatprep.subr.bf16.mxu0 %v1733_v0 }
 0x4bb   :  { %1512 = vmatpush3.bf16.msra.mxu0 %v1871_v27 }
 0x4bc   :  { %1513 = vmatprep.subr.bf16.mxu0 %v1733_v0 }
 0x4bf   :  { %1515 = vmatpush3.bf16.msra.mxu0 %v1877_v30 }
 0x4c0   :  { %1540 = vmatprep.subr.bf16.mxu0 %v1733_v0 }
 0x575   :  { %v521_v43 = vpop.f32.mrb[4].mxu0 }
 0x576   :  { %v525_v44 = vadd.f32 %v521_v43, %v454_v41  ;;  %v1227_v45 = vpop.f32.mrb[5].mxu0 }
 0x578   :  { %v526_v46 = vmul.f32 %v525_v44, %v1920_v42 }
 0x57a   :  { %1590 = vtanh.f32 %v526_v46 }
 0x584   :  { %v1591_v47 = vpop.eup %1590 }
 0x585   :  { %v528_v48 = vmul.f32 0.5, %v1591_v47 }
 0x587   :  { %v529_v49 = vadd.f32 0.5, %v528_v48 }
 0x589   :  { %v530_v50 = vsel %vm1914_vm4, %v1591_v47, %v529_v49  ;;  %v810_v49 = vld [vmem:[#allocation2 + $0xe] sm:$0x3] }
 0x58a   :  { %533 = vrot.lane.b32.xlu0 %v530_v50, %s1739_s19  ;;  %531 = vrot.lane.b32.xlu1 %v530_v50, %s1738_s18 }
 0x58e   :  { %535 = vrot.lane.b32.xlu1 %v530_v50, %s1737_s3 }
 0x5fc   :  { %v534_v51 = vpop.permute.xlu0 %533  ;;  %v532_v52 = vpop.permute.xlu1 %531 }
 0x5fd   :  { %v538_v53 = vmul.f32 %v534_v51, %v530_v50  ;;  %v537_v54 = vmul.f32 %v532_v52, %v450_v36 }
 0x5ff   :  { %v539_v55 = vadd.f32 %v538_v53, %v537_v54 }
 0x600   :  { %v536_v57 = vpop.permute.xlu1 %535 }
 0x601   :  { %1592 = vtanh.f32 %v539_v55 }
 0x60b   :  { %v1593_v56 = vpop.eup %1592 }
 0x60c   :  { %v541_v58 = vmul.f32 %v1593_v56, %v536_v57 }
 0x60e   :  { %542 = vst [vmem:[#allocation3 + $0x6] sm:$0x3] %v541_v58  ;;  %1261 = vmatmul.mubr.f32.vlgmr.msra.gmra.mrb[4].mxu1 %v541_v58 }
 0x60f   :  { %1518 = vmatpush3.bf16.msra.mxu1 %v1837_v5  ;;  %1330 = vmatprep.mubr.msk.f32.mxu1 %vm1734_vm0, %v1735_v1 }
 0x610   :  { %1519 = vmatprep.subr.bf16.mxu1 %v1733_v0 }
 0x613   :  { %1521 = vmatpush3.bf16.msra.mxu1 %v1840_v8 }
 0x614   :  { %1522 = vmatprep.subr.bf16.mxu1 %v1733_v0 }
 0x615   :  { %v899_v59 = vld [vmem:[#allocation3] sm:$0xff] }
 0x616   :  { %902 = vst.msk [vmem:[#allocation10] sm:$0xff] %vm901_vm5, %v899_v59 }
 0x617   :  { %1524 = vmatpush3.bf16.msra.mxu1 %v1845_v14 }
 0x618   :  { %1525 = vmatprep.subr.bf16.mxu1 %v1733_v0 }
 0x61b   :  { %1527 = vmatpush3.bf16.msra.mxu1 %v1851_v18 }
 0x61c   :  { %1528 = vmatprep.subr.bf16.mxu1 %v1733_v0 }
 0x61f   :  { %1530 = vmatpush3.bf16.msra.mxu1 %v1859_v21 }
 0x620   :  { %1531 = vmatprep.subr.bf16.mxu1 %v1733_v0 }
 0x623   :  { %1533 = vmatpush3.bf16.msra.mxu1 %v1865_v24 }
 0x624   :  { %1534 = vmatprep.subr.bf16.mxu1 %v1733_v0 }
 0x627   :  { %1536 = vmatpush3.bf16.msra.mxu1 %v1871_v27 }
 0x628   :  { %1537 = vmatprep.subr.bf16.mxu1 %v1733_v0 }
 0x62b   :  { %1539 = vmatpush3.bf16.msra.mxu1 %v1877_v30 }
 0x6e1   :  { %v610_v61 = vpop.f32.mrb[4].mxu1 }
 0x6e2   :  { %v614_v62 = vadd.f32 %v610_v61, %v543_v60  ;;  %v1262_v63 = vpop.f32.mrb[5].mxu1 }
 0x6e4   :  { %v615_v2 = vmul.f32 %v614_v62, %v1920_v42 }
 0x6e6   :  { %1594 = vtanh.f32 %v615_v2 }
 0x6f0   :  { %v1595_v3 = vpop.eup %1594 }
 0x6f1   :  { %v617_v4 = vmul.f32 0.5, %v1595_v3 }
 0x6f3   :  { %v618_v6 = vadd.f32 0.5, %v617_v4 }
 0x6f5   :  { %v619_v7 = vsel %vm1914_vm4, %v1595_v3, %v618_v6 }
 0x6f6   :  { %622 = vrot.lane.b32.xlu1 %v619_v7, %s1739_s19  ;;  %620 = vrot.lane.b32.xlu0 %v619_v7, %s1738_s18 }
 0x6fa   :  { %624 = vrot.lane.b32.xlu0 %v619_v7, %s1737_s3 }
 0x768   :  { %v623_v9 = vpop.permute.xlu1 %622  ;;  %v621_v10 = vpop.permute.xlu0 %620 }
 0x769   :  { %v627_v11 = vmul.f32 %v623_v9, %v619_v7  ;;  %v626_v12 = vmul.f32 %v621_v10, %v539_v55 }
 0x76b   :  { %v628_v13 = vadd.f32 %v627_v11, %v626_v12 }
 0x76c   :  { %v625_v16 = vpop.permute.xlu0 %624 }
 0x76d   :  { %1596 = vtanh.f32 %v628_v13 }
 0x777   :  { %v1597_v15 = vpop.eup %1596 }
 0x778   :  { %v630_v17 = vmul.f32 %v1597_v15, %v625_v16 }
 0x77a   :  { %631 = vst [vmem:[#allocation3 + $0x8] sm:$0x3] %v630_v17  ;;  %1296 = vmatmul.mubr.f32.vlgmr.msra.gmra.mrb[6].mxu0 %v630_v17 }
 0x77b   :  { %1542 = vmatpush3.bf16.msra.mxu0 %v1837_v5  ;;  %1365 = vmatprep.mubr.msk.f32.mxu0 %vm1734_vm0, %v1735_v1  ;;  %v632_v1 = vld [vmem:[#allocation2 + $0xa] sm:$0x3] }
 0x77c   :  { %1543 = vmatprep.subr.bf16.mxu0 %v1733_v0 }
 0x77f   :  { %1545 = vmatpush3.bf16.msra.mxu0 %v1840_v8 }
 0x780   :  { %1546 = vmatprep.subr.bf16.mxu0 %v1733_v0 }
 0x783   :  { %1548 = vmatpush3.bf16.msra.mxu0 %v1845_v14 }
 0x784   :  { %1549 = vmatprep.subr.bf16.mxu0 %v1733_v0 }
 0x787   :  { %1551 = vmatpush3.bf16.msra.mxu0 %v1851_v18 }
 0x788   :  { %1552 = vmatprep.subr.bf16.mxu0 %v1733_v0 }
 0x78b   :  { %1554 = vmatpush3.bf16.msra.mxu0 %v1859_v21 }
 0x78c   :  { %1555 = vmatprep.subr.bf16.mxu0 %v1733_v0 }
 0x78f   :  { %1557 = vmatpush3.bf16.msra.mxu0 %v1865_v24 }
 0x790   :  { %1558 = vmatprep.subr.bf16.mxu0 %v1733_v0 }
 0x793   :  { %1560 = vmatpush3.bf16.msra.mxu0 %v1871_v27 }
 0x794   :  { %1561 = vmatprep.subr.bf16.mxu0 %v1733_v0 }
 0x797   :  { %1563 = vmatpush3.bf16.msra.mxu0 %v1877_v30 }
 0x84d   :  { %v699_v5 = vpop.f32.mrb[6].mxu0 }
 0x84e   :  { %v703_v8 = vadd.f32 %v699_v5, %v632_v1  ;;  %v1297_v14 = vpop.f32.mrb[7].mxu0 }
 0x850   :  { %v704_v18 = vmul.f32 %v703_v8, %v1920_v42 }
 0x852   :  { %1598 = vtanh.f32 %v704_v18 }
 0x85c   :  { %v1599_v21 = vpop.eup %1598 }
 0x85d   :  { %v706_v19 = vmul.f32 0.5, %v1599_v21 }
 0x85f   :  { %v707_v20 = vadd.f32 0.5, %v706_v19 }
 0x861   :  { %v708_v24 = vsel %vm1914_vm4, %v1599_v21, %v707_v20 }
 0x862   :  { %711 = vrot.lane.b32.xlu0 %v708_v24, %s1739_s19  ;;  %709 = vrot.lane.b32.xlu1 %v708_v24, %s1738_s18 }
 0x866   :  { %713 = vrot.lane.b32.xlu1 %v708_v24, %s1737_s3 }
 0x8d4   :  { %v712_v0 = vpop.permute.xlu0 %711  ;;  %v710_v27 = vpop.permute.xlu1 %709 }
 0x8d5   :  { %v716_v30 = vmul.f32 %v712_v0, %v708_v24  ;;  %v715_v22 = vmul.f32 %v710_v27, %v628_v13 }
 0x8d7   :  { %v717_v23 = vadd.f32 %v716_v30, %v715_v22 }
 0x8d8   :  { %v714_v26 = vpop.permute.xlu1 %713 }
 0x8d9   :  { %1600 = vtanh.f32 %v717_v23 }
 0x8e3   :  { %v1601_v25 = vpop.eup %1600 }
 0x8e4   :  { %v719_v28 = vmul.f32 %v1601_v25, %v714_v26 }
 0x8e6   :  { %720 = vst [vmem:[#allocation3 + $0xa] sm:$0x3] %v719_v28  ;;  %1331 = vmatmul.mubr.f32.vlgmr.msra.gmra.mrb[6].mxu1 %v719_v28 }
 0x9b9   :  { %v788_v31 = vpop.f32.mrb[6].mxu1 }
 0x9ba   :  { %v792_v32 = vadd.f32 %v788_v31, %v721_v29  ;;  %v1332_v33 = vpop.f32.mrb[7].mxu1 }
 0x9bc   :  { %v793_v34 = vmul.f32 %v792_v32, %v1920_v42 }
 0x9be   :  { %1602 = vtanh.f32 %v793_v34 }
 0x9c8   :  { %v1603_v35 = vpop.eup %1602 }
 0x9c9   :  { %v795_v36 = vmul.f32 0.5, %v1603_v35 }
 0x9cb   :  { %v796_v37 = vadd.f32 0.5, %v795_v36 }
 0x9cd   :  { %v797_v38 = vsel %vm1914_vm4, %v1603_v35, %v796_v37 }
 0x9ce   :  { %800 = vrot.lane.b32.xlu1 %v797_v38, %s1739_s19  ;;  %798 = vrot.lane.b32.xlu0 %v797_v38, %s1738_s18 }
 0x9d2   :  { %802 = vrot.lane.b32.xlu0 %v797_v38, %s1737_s3 }
 0xa40   :  { %v801_v40 = vpop.permute.xlu1 %800  ;;  %v799_v41 = vpop.permute.xlu0 %798 }
 0xa41   :  { %v805_v43 = vmul.f32 %v801_v40, %v797_v38  ;;  %v804_v44 = vmul.f32 %v799_v41, %v717_v23 }
 0xa43   :  { %v806_v45 = vadd.f32 %v805_v43, %v804_v44 }
 0xa44   :  { %v803_v47 = vpop.permute.xlu0 %802 }
 0xa45   :  { %1604 = vtanh.f32 %v806_v45 }
 0xa4f   :  { %v1605_v46 = vpop.eup %1604 }
 0xa50   :  { %v808_v48 = vmul.f32 %v1605_v46, %v803_v47 }
 0xa52   :  { %809 = vst [vmem:[#allocation3 + $0xc] sm:$0x3] %v808_v48  ;;  %1366 = vmatmul.mubr.f32.vlgmr.msra.gmra.mrb[8].mxu0 %v808_v48 }
 0xb25   :  { %v877_v50 = vpop.f32.mrb[8].mxu0 }
 0xb26   :  { %v881_v51 = vadd.f32 %v877_v50, %v810_v49  ;;  %v1367_v52 = vpop.f32.mrb[9].mxu0 }
 0xb28   :  { %v882_v53 = vmul.f32 %v881_v51, %v1920_v42 }
 0xb2a   :  { %1606 = vtanh.f32 %v882_v53 }
 0xb34   :  { %v1607_v54 = vpop.eup %1606 }
 0xb35   :  { %v884_v55 = vmul.f32 0.5, %v1607_v54 }
 0xb37   :  { %v885_v56 = vadd.f32 0.5, %v884_v55 }
 0xb39   :  { %v886_v57 = vsel %vm1914_vm4, %v1607_v54, %v885_v56 }
 0xb3a   :  { %889 = vrot.lane.b32.xlu0 %v886_v57, %s1739_s19  ;;  %887 = vrot.lane.b32.xlu1 %v886_v57, %s1738_s18 }
 0xb3e   :  { %891 = vrot.lane.b32.xlu1 %v886_v57, %s1737_s3 }
 0xbac   :  { %v890_v58 = vpop.permute.xlu0 %889  ;;  %v888_v59 = vpop.permute.xlu1 %887 }
 0xbad   :  { %v894_v60 = vmul.f32 %v890_v58, %v886_v57  ;;  %v893_v61 = vmul.f32 %v888_v59, %v806_v45 }
 0xbaf   :  { %v895_v42 = vadd.f32 %v894_v60, %v893_v61 }
 0xbb1   :  { %1608 = vtanh.f32 %v895_v42  ;;  %905 = vst.msk [vmem:[#allocation11] sm:$0x3] %vm904_vm6, %v895_v42 }
 0xbb2   :  { %1687 = shalt.err (!%p1684_p0)
}
 0xbb3   :  { %s1688_s25 = scalar_lea.hbm %s2097_s7, 32 }
 0xbb4   :  { %p1689_p1 = scmp.ne.s32.totalorder %s2097_s7, %s1688_s25  ;;  %p1692_p2 = scmp.lt.u32.totalorder %s1688_s25, %s2097_s7 }
 0xbb6   :  { %p1694_p3 = pnand %p1692_p2, %p1689_p1 }
 0xbb8   :  { %1697 = shalt.err (!%p1694_p3)
}
 0xbb9   :  { %927 = dma.vmem_to_hbm [thread:$0]  %s925_s22, 32, %s2097_s7, [#allocation12]   ;;  %v892_v62 = vpop.permute.xlu1 %891 }
 0xbba   :  { %s1741_s10 = smov [#allocation10]  }
 0xbbb   :  { %v1609_v39 = vpop.eup %1608  ;;  %s911_s11 = sshll.u32 %s1741_s10, 4  ;;  %s912_s11 = int_to_ptr.vmem [resolvable:$true] %s911_s11 }
 0xbbc   :  { %v897_v63 = vmul.f32 %v1609_v39, %v892_v62  ;;  %s1698_s12 = scalar_lea.vmem %s912_s11, 256  ;;  %p1703_p5 = scmp.lt.s32.totalorder %s912_s11, %s912_s11 }
 0xbbd   :  { %p1699_p4 = scmp.ne.s32.totalorder %s912_s11, %s1698_s12  ;;  %p1704_p6 = scmp.lt.s32.totalorder %s1698_s12, %s1698_s12 }
 0xbbe   :  { %898 = vst [vmem:[#allocation3 + $0xe] sm:$0x3] %v897_v63 }
 0xbbf   :  { %p1705_p7 = por %p1704_p6, %p1703_p5 }
 0xbc1   :  { %p1706_p8 = pnand %p1705_p7, %p1699_p4 }
 0xbc5   :  { %v900_v2 = vld [vmem:[#allocation3 + $0x8] sm:$0xff] }
 0xbc6   :  { %903 = vst.msk [vmem:[#allocation10 + $0x8] sm:$0xff] %vm901_vm5, %v900_v2 }
 0xbc7   :  { %1709 = shalt.err (!%p1706_p8)
}
 0xbc8   :  { %s1710_s7 = scalar_lea.hbm %s2096_s6, 256 }
 0xbc9   :  { %p1711_p9 = scmp.ne.s32.totalorder %s2096_s6, %s1710_s7  ;;  %p1714_p10 = scmp.lt.u32.totalorder %s1710_s7, %s2096_s6 }
 0xbcb   :  { %p1716_p11 = pnand %p1714_p10, %p1711_p9 }
 0xbcd   :  { %1719 = shalt.err (!%p1716_p11)
}
 0xbce   :  { %917 = dma.vmem_to_hbm [thread:$0]  %s912_s11, 256, %s2096_s6, [#allocation6], %s1730_s13, %s1730_s13, %s1731_s14  }
 0xbcf   :  { %1724 = dma.done.wait [#allocation6], 256  }
 0xbd0   :  { %1725 = vsyncadd [#allocation6], 4294967040 }
 0xbd1   :  { %1726 = dma.done.wait [#allocation12], 32  }
 0xbd2   :  { %1727 = vsyncadd [#allocation12], 4294967264 }
 0xbd3   :  { %934 = vsyncpa [#allocation5], 1 }
 0xbd4   :  { %935 = vsyncpa [#allocation8], 1 }
 0xbd5   :  { %936 = vsyncpa [#allocation6], 1 }
 0xbd6   :  { %937 = vsyncpa [#allocation12], 1 }

</bundles_post_ra>
